<compile_context>
chip_gen: v5e
topology: v5e:2x2
jax: 0.10.0
libtpu: 0.0.40
codegen_flags: <defaults>
</compile_context>

<pallas_src>
import functools

import jax
import jax.numpy as jnp
from jax import lax
from jax.experimental import pallas as pl
from jax.experimental.pallas import tpu as pltpu


_MiB = 1024 * 1024
_CHUNK_F32_ELEMS = 128 * 1024          # ~512 KiB of f32 per live chunk intermediate
_FORCE_MULTI_STEP_BYTES = 2 * _MiB     # above this, require >= 4 grid steps


def _sublane_multiple(dtype):
    # f32 -> 8, bf16 -> 16, int8/fp8 -> 32 (sublane packing of sub-32-bit dtypes)
    itemsize = jnp.dtype(dtype).itemsize
    return max(8, 32 // itemsize)


def _physical_vmem_bytes():
    try:
        info = pltpu.get_tpu_info()
        for attr in ("vmem_capacity_bytes", "vmem_size_bytes", "vmem_bytes"):
            v = getattr(info, attr, None)
            if v:
                return int(v)
    except Exception:
        pass
    return 128 * _MiB


def _vmem_plan():
    """Generation-aware (tile_cap_bytes, vmem_limit_bytes)."""
    phys = _physical_vmem_bytes()
    limit = min((phys * 3) // 4, 96 * _MiB)      # 96 MiB on 128 MiB parts, 48 MiB on v7x
    # Double-buffered logits tiles must fit under `limit` with room for the target tile,
    # the (chunk-bounded) f32 compute temporaries and compiler-internal scratch.
    tile_cap = max(4 * _MiB, min(28 * _MiB, (limit - 12 * _MiB) // 2, phys // 4))
    return tile_cap, limit


def _divisors(n):
    ds, d = set(), 1
    while d * d <= n:
        if n % d == 0:
            ds.add(d)
            ds.add(n // d)
        d += 1
    return sorted(ds)


def _choose_tiles(N, T, C, dtype, cap_bytes, min_steps):
    """Pick (nb, tb) with nb | N, tb | T, respecting Mosaic block-shape rules and the
    per-tile byte cap; optionally require >= min_steps grid steps (pipeline overlap)."""
    itemsize = jnp.dtype(dtype).itemsize
    sub = _sublane_multiple(dtype)
    row_bytes = max(1, C * itemsize)
    max_rows = max(1, cap_bytes // row_bytes)

    # target block is (nb, T): second-minor dim nb must be a multiple of 8 or == N.
    n_opts = [d for d in _divisors(N) if d % 8 == 0 or d == N]
    # logits block is (nb, tb, C): tb must be a multiple of the sublane pack or == T.
    t_opts = [d for d in _divisors(T) if d % sub == 0 or d == T]

    def pick(steps_needed):
        best_key, best = None, None
        for nb in n_opts:
            for tb in t_opts:
                rows = nb * tb
                if rows > max_rows:
                    continue
                if (N // nb) * (T // tb) < steps_needed:
                    continue
                key = (rows, tb)           # biggest tile first, then T-contiguous DMA
                if best_key is None or key > best_key:
                    best_key, best = key, (nb, tb)
        return best

    best = pick(min_steps) or pick(1)
    if best is None:
        # TODO(synk): even the smallest aligned tile exceeds the cap (huge C with an
        # awkward T); fall back to a full-T tile and rely on the raised vmem_limit.
        return min(n_opts), T
    return best


def _choose_chunk(nb, tb, C, sub, max_elems):
    """Largest sublane-aligned divisor of tb whose (nb, chunk, C) f32 temps fit budget."""
    max_chunk = max(sub, max_elems // max(1, nb * C))
    if tb <= max_chunk:
        return tb
    d = (max_chunk // sub) * sub
    while d >= sub:
        if tb % d == 0:
            return d
        d -= sub
    return tb          # tb == un-aligned full-T fallback: single chunk


def _mtce_partial_kernel(tgt_ref, x_ref, out_ref, *, chunk):
    # tgt_ref: (nb, C) int32 target rows for this N-tile (T == C).
    # x_ref:   (nb, tb, C) logits tile in its native dtype.
    # out_ref: (1, 1) f32 partial sum in SMEM.
    nb, tb, C = x_ref.shape
    n_chunks = tb // chunk
    base = pl.program_id(1) * tb                       # global T offset of this tile

    tgt_bcast = tgt_ref[...][:, None, :]               # (nb, 1, C), hoisted out of the loop

    def chunk_sum(start):
        x = x_ref[:, pl.ds(start, chunk), :]           # (nb, chunk, C), native dtype
        # Numerically stable log-sum-exp over classes; f32 only inside the LSE.
        m = jnp.max(x, axis=-1, keepdims=True)
        e = jnp.exp((x - m).astype(jnp.float32))
        lse = m.astype(jnp.float32) + jnp.log(jnp.sum(e, axis=-1, keepdims=True))
        # One-hot select via broadcast compare against the *global* T index (3-D iota,
        # no reshape, no materialized (nb, chunk, C) int32 array).
        t_idx = lax.broadcasted_iota(jnp.int32, (1, chunk, 1), 1) + (base + start)
        sel = t_idx == tgt_bcast                       # (nb, chunk, C)
        # Fused gather-reduce: sum_{n,c} logp[n, tgt[n,c], c] over this chunk.
        return jnp.sum(jnp.where(sel, x - lse, 0.0))   # x - lse promotes to f32

    if n_chunks == 1:
        total = chunk_sum(0)
    else:
        total = lax.fori_loop(
            0, n_chunks,
            lambda c, acc: acc + chunk_sum(pl.multiple_of(c * chunk, 8)),
            jnp.float32(0.0),
        )
    out_ref[0, 0] = total


def multi_target_cross_entropy(inp, target, *, tile_cap_bytes=None,
                               vmem_limit_bytes=None, chunk_rows=None):
    """inp: (N, T, C) float logits; target: (N, T) integer classes. Returns scalar f32."""
    N, T, C = inp.shape
    assert inp.shape[0] == target.shape[0]
    assert inp.shape[1] == target.shape[1]
    assert T == C, "torch.nn.NLLLoss shape check requires T == C for (N, T, C) input"

    inp = jnp.asarray(inp)                             # DMA in native dtype; cast lazily in-kernel
    target = jnp.asarray(target).astype(jnp.int32)
    # TODO(synk): PyTorch NLLLoss raises on out-of-range targets; here invalid indices
    # silently contribute 0 (no ignore_index / class-weight support either).

    itemsize = jnp.dtype(inp.dtype).itemsize
    sub = _sublane_multiple(inp.dtype)
    auto_cap, auto_limit = _vmem_plan()
    cap = tile_cap_bytes if tile_cap_bytes is not None else auto_cap
    limit = vmem_limit_bytes if vmem_limit_bytes is not None else auto_limit

    total_bytes = N * T * C * itemsize
    min_steps = 4 if total_bytes > _FORCE_MULTI_STEP_BYTES else 1
    nb, tb = _choose_tiles(N, T, C, inp.dtype, cap, min_steps)
    gn, gt = N // nb, T // tb

    chunk = _choose_chunk(nb, tb, C, sub, _CHUNK_F32_ELEMS)
    if (chunk_rows is not None and tb % chunk_rows == 0
            and (chunk_rows % sub == 0 or chunk_rows == tb)):
        chunk = chunk_rows                              # testing / tuning override

    cost = pl.CostEstimate(
        flops=7 * N * T * C,
        transcendentals=N * T * C,
        bytes_accessed=N * T * C * itemsize + N * T * 4 + gn * gt * 4,
    )

    kernel = functools.partial(_mtce_partial_kernel, chunk=chunk)

    partials = pl.pallas_call(
        kernel,
        out_shape=jax.ShapeDtypeStruct((gn, gt), jnp.float32),
        grid=(gn, gt),
        in_specs=[
            # Per-N-tile target slice; block index is constant along j, so the pipeline
            # keeps it resident in VMEM while logits tiles stream underneath it.
            pl.BlockSpec((nb, T), lambda i, j: (i, 0)),
            # Logits tile streamed HBM->VMEM, double-buffered by the pipeline.
            # TODO(synk): bump to pipeline_mode=pl.Buffered(3) if xprof shows exposed DMA on v7x.
            pl.BlockSpec((nb, tb, C), lambda i, j: (i, j, 0)),
        ],
        out_specs=pl.BlockSpec(
            (1, 1), lambda i, j: (i, j), memory_space=pltpu.MemorySpace.SMEM
        ),
        compiler_params=pltpu.CompilerParams(
            dimension_semantics=("parallel", "parallel"),
            vmem_limit_bytes=int(limit),
        ),
        cost_estimate=cost,
    )(target, inp)

    # Tiny final reduction + normalization in plain JAX (NLLLoss 'mean' over N*C terms).
    return -jnp.sum(partials) / jnp.float32(N * C)


def _reference(inp, target):
    # Pure-JAX replica of the PyTorch forward (sanity check only).
    logp = jax.nn.log_softmax(inp.astype(jnp.float32), axis=2)      # (N, T, C)
    N, T, C = inp.shape
    j = jnp.arange(C)
    picked = logp[jnp.arange(N)[:, None], target, j[None, :]]       # (N, C)
    return -jnp.mean(picked)


if __name__ == "__main__":
    key = jax.random.PRNGKey(0)
    k1, k2, k3, k4, k5, k6 = jax.random.split(key, 6)

    # Small case matching the module (T must equal C): single-tile, single-chunk path.
    N, T, C = 2, 8, 8
    x = jax.random.normal(k1, (N, T, C), dtype=jnp.float32)
    tgt = jax.random.randint(k2, (N, T), 0, T, dtype=jnp.int32)
    loss = multi_target_cross_entropy(x, tgt)
    jax.block_until_ready(loss)
    ref = _reference(x, tgt)
    assert jnp.allclose(loss, ref, rtol=1e-5, atol=1e-5), (loss, ref)

    # Larger case with an artificially small tile cap + chunk override to exercise the
    # multi-tile grid (partial sums) and the in-kernel chunk loop.
    N2, T2, C2 = 2, 128, 128
    x2 = jax.random.normal(k3, (N2, T2, C2), dtype=jnp.float32)
    tgt2 = jax.random.randint(k4, (N2, T2), 0, T2, dtype=jnp.int32)
    loss2 = multi_target_cross_entropy(x2, tgt2, tile_cap_bytes=16 * 1024, chunk_rows=8)
    jax.block_until_ready(loss2)
    ref2 = _reference(x2, tgt2)
    assert jnp.allclose(loss2, ref2, rtol=1e-5, atol=1e-5), (loss2, ref2)

    # bf16 case: exercises the lazy-cast path (native-dtype max/compare, f32-only LSE).
    N3, T3, C3 = 2, 64, 64
    x3 = jax.random.normal(k5, (N3, T3, C3), dtype=jnp.bfloat16)
    tgt3 = jax.random.randint(k6, (N3, T3), 0, T3, dtype=jnp.int32)
    loss3 = multi_target_cross_entropy(x3, tgt3)
    jax.block_until_ready(loss3)
    ref3 = _reference(x3, tgt3)
    assert jnp.allclose(loss3, ref3, rtol=2e-2, atol=5e-2), (loss3, ref3)

    print("KERNEL_OK")
</pallas_src>

<mosaic_0001>
module attributes {stable_mosaic.version = 11 : i64} {
  func.func @_mtce_partial_kernel(%arg0: i32, %arg1: i32, %arg2: memref<2x8xi32, #tpu.memory_space<vmem>>, %arg3: memref<2x8x8xf32, #tpu.memory_space<vmem>>, %arg4: memref<1x1xf32, #tpu.memory_space<smem>>) attributes {dimension_semantics = [#tpu.dimension_semantics<parallel>, #tpu.dimension_semantics<parallel>], iteration_bounds = array<i64: 1, 1>, scalar_prefetch = 0 : i64, scratch_operands = 0 : i64, tpu.core_type = #tpu.core_type<tc>, window_params = [{transform_indices = @transform_0, window_bounds = array<i64: 2, 8>}, {transform_indices = @transform_1, window_bounds = array<i64: 2, 8, 8>}, {transform_indices = @transform_2, window_bounds = array<i64: 1, 1>}]} {
    %c8_i32 = arith.constant 8 : i32
    %0 = arith.muli %arg1, %c8_i32 : i32
    %c0 = arith.constant 0 : index
    %c0_0 = arith.constant 0 : index
    %1 = vector.load %arg2[%c0, %c0_0] : memref<2x8xi32, #tpu.memory_space<vmem>>, vector<2x8xi32>
    %2 = vector.shape_cast %1 : vector<2x8xi32> to vector<2x1x8xi32>
    %c0_1 = arith.constant 0 : index
    %c0_2 = arith.constant 0 : index
    %c0_3 = arith.constant 0 : index
    %3 = vector.load %arg3[%c0_1, %c0_2, %c0_3] : memref<2x8x8xf32, #tpu.memory_space<vmem>>, vector<2x8x8xf32>
    %cst = arith.constant dense<0xFF800000> : vector<2x8xf32>
    %4 = vector.multi_reduction <maximumf>, %3, %cst [2] : vector<2x8x8xf32> to vector<2x8xf32>
    %5 = vector.shape_cast %4 : vector<2x8xf32> to vector<2x8x1xf32>
    %6 = vector.broadcast %5 : vector<2x8x1xf32> to vector<2x8x8xf32>
    %7 = arith.subf %3, %6 : vector<2x8x8xf32>
    %8 = math.exp %7 : vector<2x8x8xf32>
    %cst_4 = arith.constant dense<0.000000e+00> : vector<2x8xf32>
    %9 = vector.multi_reduction <add>, %8, %cst_4 [2] : vector<2x8x8xf32> to vector<2x8xf32>
    %10 = vector.shape_cast %9 : vector<2x8xf32> to vector<2x8x1xf32>
    %11 = math.log %10 : vector<2x8x1xf32>
    %12 = arith.addf %5, %11 : vector<2x8x1xf32>
    %13 = tpu.iota {dimensions = array<i32: 1>} : vector<1x8x1xi32>
    %c0_i32 = arith.constant 0 : i32
    %14 = arith.addi %0, %c0_i32 : i32
    %15 = vector.broadcast %14 : i32 to vector<1x8x1xi32>
    %16 = arith.addi %13, %15 : vector<1x8x1xi32>
    %17 = vector.broadcast %16 : vector<1x8x1xi32> to vector<2x8x8xi32>
    %18 = vector.broadcast %2 : vector<2x1x8xi32> to vector<2x8x8xi32>
    %19 = arith.cmpi eq, %17, %18 : vector<2x8x8xi32>
    %20 = vector.broadcast %12 : vector<2x8x1xf32> to vector<2x8x8xf32>
    %21 = arith.subf %3, %20 : vector<2x8x8xf32>
    %cst_5 = arith.constant 0.000000e+00 : f32
    %22 = vector.broadcast %cst_5 : f32 to vector<2x8x8xf32>
    %23 = arith.select %19, %21, %22 : vector<2x8x8xi1>, vector<2x8x8xf32>
    %24 = vector.shape_cast %23 : vector<2x8x8xf32> to vector<1x2x8x8xf32>
    %cst_6 = arith.constant dense<0.000000e+00> : vector<1xf32>
    %25 = vector.multi_reduction <add>, %24, %cst_6 [1, 2, 3] : vector<1x2x8x8xf32> to vector<1xf32>
    %26 = vector.shape_cast %25 : vector<1xf32> to vector<1x1x1x1xf32>
    %27 = vector.extract %26[0, 0, 0, 0] : f32 from vector<1x1x1x1xf32>
    %c0_7 = arith.constant 0 : index
    %c0_8 = arith.constant 0 : index
    %28 = memref.load %arg4[%c0_7, %c0_8] : memref<1x1xf32, #tpu.memory_space<smem>>
    memref.store %27, %arg4[%c0_7, %c0_8] : memref<1x1xf32, #tpu.memory_space<smem>>
    return
  }
  func.func @transform_0(%arg0: i32, %arg1: i32) -> (i32, i32) {
    %c0_i32 = arith.constant 0 : i32
    %c0_i32_0 = arith.constant 0 : i32
    return %arg0, %c0_i32 : i32, i32
  }
  func.func @transform_1(%arg0: i32, %arg1: i32) -> (i32, i32, i32) {
    %c0_i32 = arith.constant 0 : i32
    %c0_i32_0 = arith.constant 0 : i32
    return %arg0, %arg1, %c0_i32 : i32, i32, i32
  }
  func.func @transform_2(%arg0: i32, %arg1: i32) -> (i32, i32) {
    %c0_i32 = arith.constant 0 : i32
    return %arg0, %arg1 : i32, i32
  }
}

</mosaic_0001>

<bundles_post_ra>
// kernel: tpu_custom_call.1
= control target key start
LH: loop header
LB: loop body
LE: loop exit
PB: predicated region body
PF: predicated region fallthrough
CT: control target
= control target key end

     0   :  { %7 = vsyncpa [#allocation3], 0  ;;  %s231_s0 = inlined_call_operand.hbm [shape: s32[2,8], index: 0, kind: input, shape index: {}]   ;;  %s232_s1 = inlined_call_operand.hbm [shape: f32[2,8,8], index: 1, kind: input, shape index: {}]   ;;  %s233_s2 = inlined_call_operand.hbm [shape: f32[1,1], index: 2, kind: output, shape index: {}]  }
   0x1   :  { %8 = vsyncpa [#allocation6], 0 }
   0x2   :  { %9 = vsyncpa [#allocation4], 0  ;;  %s15_s11 = sshll.u32 %s231_s0, 4  ;;  %s196_s12 = smov [#allocation2]   ;;  %s16_s11 = int_to_ptr.hbm [resolvable:$true] %s15_s11 }
   0x3   :  { %s17_s13 = sshll.u32 %s196_s12, 4  ;;  %s25_s16 = sshll.u32 %s232_s1, 4  ;;  %s18_s13 = int_to_ptr.vmem [resolvable:$true] %s17_s13  ;;  %s26_s16 = int_to_ptr.hbm [resolvable:$true] %s25_s16 }
   0x4   :  { %20 = dma.hbm_to_vmem [thread:$0]  %s16_s11, 32, %s18_s13, [#allocation3]  }
   0x5   :  { %s197_s17 = smov [#allocation5]   ;;  %s198_s19 = smov 128  }
   0x6   :  { %s27_s18 = sshll.u32 %s197_s17, 4  ;;  %s199_s20 = smov 8   ;;  %s28_s18 = int_to_ptr.vmem [resolvable:$true] %s27_s18 }
   0x7   :  { %33 = dma.hbm_to_vmem [thread:$0]  %s26_s16, 256, %s28_s18, [#allocation6], %s198_s19, %s198_s19, %s199_s20  }
   0x8   :  { %190 = dma.done.wait [#allocation3], 32  }
   0x9   :  { %191 = vsyncadd [#allocation3], 4294967264 }
   0xa   :  { %192 = dma.done.wait [#allocation6], 256  }
   0xb   :  { %193 = vsyncadd [#allocation6], 4294967040  ;;  %vm47_vm0 = vcmask 64512   ;;  %v45_v0 = vld [vmem:[#allocation5] sm:$0xff]  ;;  %v46_v2 = vld [vmem:[#allocation5 + $0x8] sm:$0xff]  ;;  %v72_v18 = vlaneseq  ;;  %s103_s21 = sshll.u32 %s233_s2, 4  ;;  %s104_s21 = int_to_ptr.hbm [resolvable:$true] %s103_s21 }
   0xc   :  { %v48_v1 = vsel %vm47_vm0, %v45_v0, -inf  ;;  %v51_v3 = vsel %vm47_vm0, %v46_v2, -inf  ;;  %v43_v19 = vld [vmem:[#allocation2] sm:$0x3]  ;;  %s200_s23 = smov [#allocation7]  }
   0xd   :  { %49 = vmax.xlane.f32.xlu0 %v48_v1  ;;  %v44_v20 = vrot.slane %v43_v19, 1  ;;  %v73_v22 = vshrl.u32 %v72_v18, 7  ;;  %v76_v23 = vperm.slane %v43_v19, 0 }
   0xf   :  { %v77_v25 = vperm.slane %v44_v20, 0  ;;  %vm78_vm1 = vcmp.eq.s32.totalorder %v73_v22, %v76_v23 }
  0x11   :  { %vm79_vm2 = vcmp.eq.s32.totalorder %v73_v22, %v77_v25 }
  0x15   :  { %52 = vmax.xlane.f32.xlu0 %v51_v3 }
  0x80   :  { %v50_v4 = vpop.xlane.xlu0 %49 }
  0x81   :  { %v54_v5 = vsub.f32 %v45_v0, %v50_v4 }
  0x83   :  { %v56_v6 = vmul.f32 1.442695, %v54_v5 }
  0x85   :  { %122 = vpow2.f32 %v56_v6 }
  0x88   :  { %v53_v7 = vpop.xlane.xlu0 %52 }
  0x89   :  { %v55_v8 = vsub.f32 %v46_v2, %v53_v7 }
  0x8b   :  { %v123_v9 = vpop.eup %122  ;;  %v58_v10 = vmul.f32 1.442695, %v55_v8 }
  0x8c   :  { %v60_v11 = vsel %vm47_vm0, %v123_v9, 0.0 }
  0x8d   :  { %124 = vpow2.f32 %v58_v10  ;;  %61 = vadd.xlane.f32.xlu1 %v60_v11 }
  0x93   :  { %v125_v12 = vpop.eup %124 }
  0x94   :  { %v63_v13 = vsel %vm47_vm0, %v125_v12, 0.0 }
  0x95   :  { %64 = vadd.xlane.f32.xlu1 %v63_v13 }
 0x100   :  { %v62_v14 = vpop.xlane.xlu1 %61 }
 0x101   :  { %126 = vlog2.f32 %v62_v14 }
 0x107   :  { %v127_v15 = vpop.eup %126 }
 0x108   :  { %v67_v16 = vmul.f32 0.6931472, %v127_v15  ;;  %v65_v17 = vpop.xlane.xlu1 %64 }
 0x109   :  { %128 = vlog2.f32 %v65_v17 }
 0x10a   :  { %v70_v21 = vadd.f32 %v67_v16, %v50_v4 }
 0x10c   :  { %v80_v27 = vsub.f32 %v45_v0, %v70_v21 }
 0x10e   :  { %v82_v30 = vsel %vm78_vm1, %v80_v27, 0.0 }
 0x10f   :  { %v129_v24 = vpop.eup %128  ;;  %v84_v32 = vsel %vm47_vm0, %v82_v30, 0.0 }
 0x110   :  { %v69_v26 = vmul.f32 0.6931472, %v129_v24 }
 0x112   :  { %v71_v28 = vadd.f32 %v69_v26, %v53_v7 }
 0x114   :  { %v81_v29 = vsub.f32 %v46_v2, %v71_v28 }
 0x116   :  { %v83_v31 = vsel %vm79_vm2, %v81_v29, 0.0 }
 0x117   :  { %v85_v33 = vsel %vm47_vm0, %v83_v31, 0.0 }
 0x118   :  { %v86_v34 = vadd.f32 %v85_v33, %v84_v32 }
 0x11a   :  { %87 = vadd.xlane.f32.xlu2 %v86_v34 }
 0x18d   :  { %v88_v35 = vpop.xlane.xlu2 %87 }
 0x18e   :  { %v89_v36 = vrot.slane %v88_v35, 4 }
 0x190   :  { %v90_v37 = vadd.f32 %v89_v36, %v88_v35 }
 0x192   :  { %v91_v38 = vrot.slane %v90_v37, 2 }
 0x194   :  { %v92_v39 = vadd.f32 %v91_v38, %v90_v37 }
 0x196   :  { %v93_v40 = vrot.slane %v92_v39, 1 }
 0x198   :  { %v94_v41 = vadd.f32 %v93_v40, %v92_v39 }
 0x19a   :  { %115 = vpush %v94_v41 }
 0x1cb   :  { %s116_s22 = spop %115 }
 0x1cc   :  { %97 = sst [smem:[#allocation7]] %s116_s22 }
 0x1cd   :  { %106 = dma.smem_to_hbm %s200_s23, 16, %s104_s21, [#allocation4]  }
 0x1ce   :  { %194 = dma.done.wait [#allocation4], 16  }
 0x1cf   :  { %195 = vsyncadd [#allocation4], 4294967280 }
 0x1d0   :  { %111 = sfence }
 0x1d1   :  { %112 = vsyncpa [#allocation3], 1 }
 0x1d2   :  { %113 = vsyncpa [#allocation6], 1 }
 0x1d3   :  { %114 = vsyncpa [#allocation4], 1 }

</bundles_post_ra>
